<compile_context>
chip_gen: v7x
topology: tpu7x:2x2x1
jax: 0.10.0
libtpu: 0.0.40
codegen_flags: <defaults>
</compile_context>

<pallas_src>
import functools

import jax
import jax.numpy as jnp
from jax.experimental import pallas as pl
from jax.experimental.pallas import tpu as pltpu

_LANE = 128


def _round_up(n, m):
    return ((n + m - 1) // m) * m


def _next_pow2(n):
    p = 1
    while p < n:
        p *= 2
    return p


def _device_kind():
    try:
        return jax.devices()[0].device_kind.lower()
    except Exception:  # pragma: no cover - device query should not fail on TPU
        return ""


def _mention_mlp_kernel(x_ref, w1_ref, b1_ref, w2_ref, b2_ref, w3_ref, b3_ref, o_ref,
                        *, act_bf16):
    """Fused 3-layer MLP on one row tile of spans. All operands live in VMEM."""

    def leaky_to_bf16(h):
        # Dropout = identity (eval mode).
        if act_bf16:
            hb = h.astype(jnp.bfloat16)          # bf16 VALU path (v6e/v7x)
            return jnp.maximum(hb, hb * 0.01)
        return jnp.maximum(h, 0.01 * h).astype(jnp.bfloat16)   # f32 VALU path (v5)

    # Layer 1: Linear (bf16 x bf16 -> f32 accumulate) + LeakyReLU(0.01).
    h = jnp.dot(x_ref[...], w1_ref[...], preferred_element_type=jnp.float32) + b1_ref[...]
    h = leaky_to_bf16(h)

    # Layer 2: Linear + LeakyReLU(0.01).
    h = jnp.dot(h, w2_ref[...], preferred_element_type=jnp.float32) + b2_ref[...]
    h = leaky_to_bf16(h)

    # Layer 3: Linear -> logits (lane-padded to 128 classes; real classes are [:, :C]).
    out = jnp.dot(h, w3_ref[...], preferred_element_type=jnp.float32) + b3_ref[...]
    o_ref[...] = out.astype(o_ref.dtype)         # bf16 lane-dense store


@functools.partial(jax.jit, static_argnames=("tm", "act_bf16"))
def _mention_mlp_padded(x_pad, w1, b1, w2, b2, w3, b3, *, tm, act_bf16):
    """Runs the MLP kernel over a row/lane-padded [N_pad, D_pad] bf16 span matrix."""
    n_pad, d_pad = x_pad.shape
    h_pad = w1.shape[1]
    c_pad = w3.shape[1]

    grid = (n_pad // tm,)
    full = lambda i: (0, 0)        # weights / biases: one full block, resident once
    once = pl.Buffered(1)          # grid-invariant => single-buffer (no double-buffer)

    flops = 2 * n_pad * (d_pad * h_pad + h_pad * h_pad + h_pad * c_pad)
    bytes_accessed = (x_pad.size * 2                                   # bf16 activations
                      + (w1.size + w2.size + w3.size) * 2              # bf16 weights
                      + (b1.size + b2.size + b3.size) * 4              # f32 biases
                      + n_pad * c_pad * 2)                             # bf16 logits out

    # Explicit scoped-VMEM budget: single-buffered weights + double-buffered x/out tiles
    # + f32 intermediates, with 2x headroom (clamped to v7x physical 64 MiB).
    footprint = ((w1.size + w2.size + w3.size) * 2
                 + (b1.size + b2.size + b3.size) * 4
                 + 2 * tm * d_pad * 2            # x tile, double-buffered bf16
                 + 2 * tm * c_pad * 2            # out tile, double-buffered bf16
                 + 3 * tm * h_pad * 4)           # f32 inter-layer intermediates
    vmem_limit = min(2 * footprint + (8 << 20), 64 << 20)

    kernel = functools.partial(_mention_mlp_kernel, act_bf16=act_bf16)

    return pl.pallas_call(
        kernel,
        out_shape=jax.ShapeDtypeStruct((n_pad, c_pad), jnp.bfloat16),
        grid_spec=pltpu.PrefetchScalarGridSpec(
            num_scalar_prefetch=0,
            grid=grid,
            in_specs=[
                pl.BlockSpec((tm, d_pad), lambda i: (i, 0)),                  # x tile
                pl.BlockSpec((d_pad, h_pad), full, pipeline_mode=once),       # W1 bf16
                pl.BlockSpec((1, h_pad), full, pipeline_mode=once),           # b1 f32
                pl.BlockSpec((h_pad, h_pad), full, pipeline_mode=once),       # W2 bf16
                pl.BlockSpec((1, h_pad), full, pipeline_mode=once),           # b2 f32
                pl.BlockSpec((h_pad, c_pad), full, pipeline_mode=once),       # W3 bf16
                pl.BlockSpec((1, c_pad), full, pipeline_mode=once),           # b3 f32
            ],
            out_specs=pl.BlockSpec((tm, c_pad), lambda i: (i, 0)),            # lane-dense
        ),
        compiler_params=pltpu.CompilerParams(
            dimension_semantics=("parallel",),
            vmem_limit_bytes=int(vmem_limit)),
        cost_estimate=pl.CostEstimate(
            flops=flops, transcendentals=0, bytes_accessed=int(bytes_accessed)),
    )(x_pad, w1, b1, w2, b2, w3, b3)


def init_mention_classifier_params(key, input_dim, hidden_dim=768, num_classes=3):
    """Xavier-normal weights stored transposed [in, out], bf16, zero-padded to 128 lanes.

    PyTorch nn.Linear stores [out, in] and computes x @ W^T; we store the transpose so
    the kernel computes y = x @ W + b directly. Padding rows/cols are exact zeros, so
    padded dims contribute nothing to the real logits.
    """
    d_pad = _round_up(input_dim, _LANE)
    h_pad = _round_up(hidden_dim, _LANE)
    c_pad = _round_up(num_classes, _LANE)

    def xavier_normal(k, fan_in, fan_out, rows_pad, cols_pad):
        std = (2.0 / (fan_in + fan_out)) ** 0.5
        w = std * jax.random.normal(k, (fan_in, fan_out), dtype=jnp.float32)
        w = jax.lax.pad(w, jnp.float32(0.0),
                        ((0, rows_pad - fan_in, 0), (0, cols_pad - fan_out, 0)))
        return w.astype(jnp.bfloat16)

    k1, k2, k3 = jax.random.split(key, 3)
    return {
        "w1": xavier_normal(k1, input_dim, hidden_dim, d_pad, h_pad),
        "b1": jnp.zeros((1, h_pad), jnp.float32),
        "w2": xavier_normal(k2, hidden_dim, hidden_dim, h_pad, h_pad),
        "b2": jnp.zeros((1, h_pad), jnp.float32),
        "w3": xavier_normal(k3, hidden_dim, num_classes, h_pad, c_pad),
        "b3": jnp.zeros((1, c_pad), jnp.float32),
        "input_dim": input_dim,
        "hidden_dim": hidden_dim,
        "num_classes": num_classes,
    }


def _pick_tm(total, device_kind):
    """Row tile choice. v5e: 128 (4x128 MXU, tight scoped VMEM). v6e/v7x: 128 unless the
    batch is large enough that 256-row tiles still leave >=2 grid steps per TC."""
    if "v5" in device_kind:
        return 128
    return 256 if total > 1024 else 128


def mention_classifier_forward(span_embeddings_batch, params, *, tm=None):
    """Mirrors MentionClassifier.forward: list in, list of per-sentence logits out."""
    num_classes = params["num_classes"]
    input_dim = params["input_dim"]
    d_pad = params["w1"].shape[0]

    sizes = [int(x.shape[0]) if (x.ndim == 2 and x.size > 0) else 0
             for x in span_embeddings_batch]
    total = sum(sizes)
    empty = jnp.empty((0, num_classes), jnp.float32)
    if total == 0:
        return [empty for _ in span_embeddings_batch]

    kind = _device_kind()
    if tm is None:
        tm = _pick_tm(total, kind)
    act_bf16 = "v5" not in kind   # bf16 VALU activation on v6e/v7x only

    # Build the concatenated matrix directly in bf16 (single pre-kernel HBM pass).
    mats = [x.astype(jnp.bfloat16)
            for x, s in zip(span_embeddings_batch, sizes) if s > 0]
    x_cat = mats[0] if len(mats) == 1 else jnp.concatenate(mats, axis=0)

    # Bucket padded row count to a power-of-two multiple of tm: padded rows are one
    # cheap extra grid step; per-shape recompiles are not.
    n_pad = tm * _next_pow2(-(-total // tm))
    x_pad = jax.lax.pad(x_cat, jnp.zeros((), jnp.bfloat16),
                        ((0, n_pad - total, 0), (0, d_pad - input_dim, 0)))

    logits_pad = _mention_mlp_padded(
        x_pad, params["w1"], params["b1"], params["w2"], params["b2"],
        params["w3"], params["b3"], tm=tm, act_bf16=act_bf16)
    logits = logits_pad[:total, :num_classes].astype(jnp.float32)

    outs, off = [], 0
    for s in sizes:
        if s == 0:
            outs.append(empty)
        else:
            outs.append(logits[off:off + s])
            off += s
    return outs


def _reference_forward(span_embeddings_batch, params):
    """Plain-JAX reference with the same precision policy (bf16 matmuls, f32 accum,
    bf16 output, eval-mode dropout = identity)."""
    d = params["input_dim"]
    c = params["num_classes"]

    def leaky(x):
        return jnp.maximum(x, 0.01 * x)

    outs = []
    for x in span_embeddings_batch:
        if x.size == 0:
            outs.append(jnp.empty((0, c), jnp.float32))
            continue
        xb = x.astype(jnp.bfloat16)
        h = leaky(jnp.dot(xb, params["w1"][:d],
                          preferred_element_type=jnp.float32) + params["b1"])
        h = leaky(jnp.dot(h.astype(jnp.bfloat16), params["w2"],
                          preferred_element_type=jnp.float32) + params["b2"])
        o = jnp.dot(h.astype(jnp.bfloat16), params["w3"],
                    preferred_element_type=jnp.float32) + params["b3"]
        outs.append(o.astype(jnp.bfloat16)[:, :c].astype(jnp.float32))
    return outs


if __name__ == "__main__":
    key = jax.random.PRNGKey(0)
    k_params, k_x1, k_x2 = jax.random.split(key, 3)

    INPUT_DIM = 32      # padded to 128 inside init
    HIDDEN_DIM = 128
    NUM_CLASSES = 3     # padded to 128 inside init; sliced back in the wrapper

    params = init_mention_classifier_params(
        k_params, INPUT_DIM, hidden_dim=HIDDEN_DIM, num_classes=NUM_CLASSES)

    # Batch of 3 sentences: 5 spans, 0 spans (empty), 12 spans.
    span_embeddings_batch = [
        jax.random.normal(k_x1, (5, INPUT_DIM), dtype=jnp.float32),
        jnp.empty((0, INPUT_DIM), jnp.float32),
        jax.random.normal(k_x2, (12, INPUT_DIM), dtype=jnp.float32),
    ]

    logits = mention_classifier_forward(span_embeddings_batch, params)
    logits = [jax.block_until_ready(l) for l in logits]

    # Correctness check against a plain-JAX reference with the same precision policy.
    ref = _reference_forward(span_embeddings_batch, params)
    assert logits[0].shape == (5, NUM_CLASSES)
    assert logits[1].shape == (0, NUM_CLASSES)
    assert logits[2].shape == (12, NUM_CLASSES)
    for got, want in zip(logits, ref):
        if want.size:
            assert jnp.allclose(got, want, atol=2e-2, rtol=2e-2), "mismatch vs reference"

    print("KERNEL_OK")
</pallas_src>

<mosaic_0001>
module attributes {stable_mosaic.version = 11 : i64} {
  func.func @_mention_mlp_kernel(%arg0: i32, %arg1: memref<128x128xbf16, #tpu.memory_space<vmem>>, %arg2: memref<128x128xbf16, #tpu.memory_space<vmem>>, %arg3: memref<1x128xf32, #tpu.memory_space<vmem>>, %arg4: memref<128x128xbf16, #tpu.memory_space<vmem>>, %arg5: memref<1x128xf32, #tpu.memory_space<vmem>>, %arg6: memref<128x128xbf16, #tpu.memory_space<vmem>>, %arg7: memref<1x128xf32, #tpu.memory_space<vmem>>, %arg8: memref<128x128xbf16, #tpu.memory_space<vmem>>) attributes {dimension_semantics = [#tpu.dimension_semantics<parallel>], iteration_bounds = array<i64: 1>, scalar_prefetch = 0 : i64, scratch_operands = 0 : i64, tpu.core_type = #tpu.core_type<tc>, window_params = [{transform_indices = @transform_0, window_bounds = array<i64: 128, 128>}, {pipeline_mode = #tpu.pipeline_mode<synchronous>, transform_indices = @transform_1, window_bounds = array<i64: 128, 128>}, {pipeline_mode = #tpu.pipeline_mode<synchronous>, transform_indices = @transform_2, window_bounds = array<i64: 1, 128>}, {pipeline_mode = #tpu.pipeline_mode<synchronous>, transform_indices = @transform_3, window_bounds = array<i64: 128, 128>}, {pipeline_mode = #tpu.pipeline_mode<synchronous>, transform_indices = @transform_4, window_bounds = array<i64: 1, 128>}, {pipeline_mode = #tpu.pipeline_mode<synchronous>, transform_indices = @transform_5, window_bounds = array<i64: 128, 128>}, {pipeline_mode = #tpu.pipeline_mode<synchronous>, transform_indices = @transform_6, window_bounds = array<i64: 1, 128>}, {transform_indices = @transform_7, window_bounds = array<i64: 128, 128>}]} {
    %c0 = arith.constant 0 : index
    %c0_0 = arith.constant 0 : index
    %0 = vector.load %arg1[%c0, %c0_0] : memref<128x128xbf16, #tpu.memory_space<vmem>>, vector<128x128xbf16>
    %c0_1 = arith.constant 0 : index
    %c0_2 = arith.constant 0 : index
    %1 = vector.load %arg2[%c0_1, %c0_2] : memref<128x128xbf16, #tpu.memory_space<vmem>>, vector<128x128xbf16>
    %cst = arith.constant dense<0.000000e+00> : vector<128x128xf32>
    %2 = tpu.matmul %0, %1, %cst {dimension_numbers = #tpu.dot_dimension_numbers<[1], [0], [0], [1], [0, 0, 1, 1], [], []>} : vector<128x128xbf16>, vector<128x128xbf16>, vector<128x128xf32> -> vector<128x128xf32>
    %c0_3 = arith.constant 0 : index
    %c0_4 = arith.constant 0 : index
    %3 = vector.load %arg3[%c0_3, %c0_4] : memref<1x128xf32, #tpu.memory_space<vmem>>, vector<1x128xf32>
    %4 = vector.broadcast %3 : vector<1x128xf32> to vector<128x128xf32>
    %5 = arith.addf %2, %4 : vector<128x128xf32>
    %6 = arith.truncf %5 : vector<128x128xf32> to vector<128x128xbf16>
    %cst_5 = arith.constant 1.000980e-02 : bf16
    %7 = vector.broadcast %cst_5 : bf16 to vector<128x128xbf16>
    %8 = arith.mulf %6, %7 : vector<128x128xbf16>
    %9 = arith.maximumf %6, %8 : vector<128x128xbf16>
    %c0_6 = arith.constant 0 : index
    %c0_7 = arith.constant 0 : index
    %10 = vector.load %arg4[%c0_6, %c0_7] : memref<128x128xbf16, #tpu.memory_space<vmem>>, vector<128x128xbf16>
    %cst_8 = arith.constant dense<0.000000e+00> : vector<128x128xf32>
    %11 = tpu.matmul %9, %10, %cst_8 {dimension_numbers = #tpu.dot_dimension_numbers<[1], [0], [0], [1], [0, 0, 1, 1], [], []>} : vector<128x128xbf16>, vector<128x128xbf16>, vector<128x128xf32> -> vector<128x128xf32>
    %c0_9 = arith.constant 0 : index
    %c0_10 = arith.constant 0 : index
    %12 = vector.load %arg5[%c0_9, %c0_10] : memref<1x128xf32, #tpu.memory_space<vmem>>, vector<1x128xf32>
    %13 = vector.broadcast %12 : vector<1x128xf32> to vector<128x128xf32>
    %14 = arith.addf %11, %13 : vector<128x128xf32>
    %15 = arith.truncf %14 : vector<128x128xf32> to vector<128x128xbf16>
    %cst_11 = arith.constant 1.000980e-02 : bf16
    %16 = vector.broadcast %cst_11 : bf16 to vector<128x128xbf16>
    %17 = arith.mulf %15, %16 : vector<128x128xbf16>
    %18 = arith.maximumf %15, %17 : vector<128x128xbf16>
    %c0_12 = arith.constant 0 : index
    %c0_13 = arith.constant 0 : index
    %19 = vector.load %arg6[%c0_12, %c0_13] : memref<128x128xbf16, #tpu.memory_space<vmem>>, vector<128x128xbf16>
    %cst_14 = arith.constant dense<0.000000e+00> : vector<128x128xf32>
    %20 = tpu.matmul %18, %19, %cst_14 {dimension_numbers = #tpu.dot_dimension_numbers<[1], [0], [0], [1], [0, 0, 1, 1], [], []>} : vector<128x128xbf16>, vector<128x128xbf16>, vector<128x128xf32> -> vector<128x128xf32>
    %c0_15 = arith.constant 0 : index
    %c0_16 = arith.constant 0 : index
    %21 = vector.load %arg7[%c0_15, %c0_16] : memref<1x128xf32, #tpu.memory_space<vmem>>, vector<1x128xf32>
    %22 = vector.broadcast %21 : vector<1x128xf32> to vector<128x128xf32>
    %23 = arith.addf %20, %22 : vector<128x128xf32>
    %24 = arith.truncf %23 : vector<128x128xf32> to vector<128x128xbf16>
    %c0_17 = arith.constant 0 : index
    %c0_18 = arith.constant 0 : index
    %25 = vector.load %arg8[%c0_17, %c0_18] : memref<128x128xbf16, #tpu.memory_space<vmem>>, vector<128x128xbf16>
    tpu.vector_store %arg8[%c0_17, %c0_18], %24 {strides = array<i32>} : memref<128x128xbf16, #tpu.memory_space<vmem>>, vector<128x128xbf16>,
    return
  }
  func.func @transform_0(%arg0: i32) -> (i32, i32) {
    %c0_i32 = arith.constant 0 : i32
    %c0_i32_0 = arith.constant 0 : i32
    return %arg0, %c0_i32 : i32, i32
  }
  func.func @transform_1(%arg0: i32) -> (i32, i32) {
    %c0_i32 = arith.constant 0 : i32
    %c0_i32_0 = arith.constant 0 : i32
    %c0_i32_1 = arith.constant 0 : i32
    return %c0_i32, %c0_i32_0 : i32, i32
  }
  func.func @transform_2(%arg0: i32) -> (i32, i32) {
    %c0_i32 = arith.constant 0 : i32
    %c0_i32_0 = arith.constant 0 : i32
    %c0_i32_1 = arith.constant 0 : i32
    return %c0_i32, %c0_i32_0 : i32, i32
  }
  func.func @transform_3(%arg0: i32) -> (i32, i32) {
    %c0_i32 = arith.constant 0 : i32
    %c0_i32_0 = arith.constant 0 : i32
    %c0_i32_1 = arith.constant 0 : i32
    return %c0_i32, %c0_i32_0 : i32, i32
  }
  func.func @transform_4(%arg0: i32) -> (i32, i32) {
    %c0_i32 = arith.constant 0 : i32
    %c0_i32_0 = arith.constant 0 : i32
    %c0_i32_1 = arith.constant 0 : i32
    return %c0_i32, %c0_i32_0 : i32, i32
  }
  func.func @transform_5(%arg0: i32) -> (i32, i32) {
    %c0_i32 = arith.constant 0 : i32
    %c0_i32_0 = arith.constant 0 : i32
    %c0_i32_1 = arith.constant 0 : i32
    return %c0_i32, %c0_i32_0 : i32, i32
  }
  func.func @transform_6(%arg0: i32) -> (i32, i32) {
    %c0_i32 = arith.constant 0 : i32
    %c0_i32_0 = arith.constant 0 : i32
    %c0_i32_1 = arith.constant 0 : i32
    return %c0_i32, %c0_i32_0 : i32, i32
  }
  func.func @transform_7(%arg0: i32) -> (i32, i32) {
    %c0_i32 = arith.constant 0 : i32
    %c0_i32_0 = arith.constant 0 : i32
    return %arg0, %c0_i32 : i32, i32
  }
}

</mosaic_0001>

<bundles_post_ra>
// kernel: _mention_mlp_padded.1
= control target key start
LH: loop header
LB: loop body
LE: loop exit
PB: predicated region body
PF: predicated region fallthrough
CT: control target
= control target key end

     0   :  { %12 = vsyncpa [#allocation3], 0  ;;  %s1381_s0 = inlined_call_operand.hbm [shape: bf16[128,128], index: 0, kind: input, shape index: {}]   ;;  %s1382_s1 = inlined_call_operand.hbm [shape: bf16[128,128], index: 1, kind: input, shape index: {}]   ;;  %s1383_s2 = inlined_call_operand.vmem [shape: f32[1,128], index: 2, kind: input, shape index: {}]   ;;  %s1384_s3 = inlined_call_operand.hbm [shape: bf16[128,128], index: 3, kind: input, shape index: {}]   ;;  %s1385_s4 = inlined_call_operand.vmem [shape: f32[1,128], index: 4, kind: input, shape index: {}]   ;;  %s1386_s5 = inlined_call_operand.hbm [shape: bf16[128,128], index: 5, kind: input, shape index: {}]   ;;  %s1387_s6 = inlined_call_operand.vmem [shape: f32[1,128], index: 6, kind: input, shape index: {}]   ;;  %s1388_s7 = inlined_call_operand.hbm [shape: bf16[128,128], index: 7, kind: output, shape index: {}]  }
   0x1   :  { %13 = vsyncpa [#allocation6], 0 }
   0x2   :  { %14 = vsyncpa [#allocation9], 0 }
   0x3   :  { %15 = vsyncpa [#allocation4], 0  ;;  %s1230_s24 = smov [#allocation5]   ;;  %s1231_s26 = smov [#allocation2]  }
   0x4   :  { %s33_s25 = sshll.u32 %s1230_s24, 4  ;;  %s21_s27 = sshll.u32 %s1231_s26, 4  ;;  %s34_s25 = int_to_ptr.vmem [resolvable:$true] %s33_s25  ;;  %s1277_s27 = int_to_ptr.vmem [resolvable:$true] %s21_s27 }
   0x5   :  { %s1112_s30 = scalar_lea.hbm %s1382_s1, 1024 }
   0x6   :  { %p1113_p0 = scmp.ne.s32.totalorder %s1382_s1, %s1112_s30  ;;  %p1116_p1 = scmp.lt.u32.totalorder %s1112_s30, %s1382_s1 }
   0x8   :  { %p1118_p2 = pnand %p1116_p1, %p1113_p0 }
   0xa   :  { %1121 = shalt.err (!%p1118_p2)
}
   0xb   :  { %s1122_s12 = scalar_lea.vmem %s34_s25, 1024  ;;  %p1127_p4 = scmp.lt.s32.totalorder %s34_s25, %s34_s25 }
   0xc   :  { %p1123_p3 = scmp.ne.s32.totalorder %s34_s25, %s1122_s12  ;;  %p1128_p5 = scmp.lt.s32.totalorder %s1122_s12, %s1122_s12 }
   0xe   :  { %p1129_p6 = por %p1128_p5, %p1127_p4 }
  0x10   :  { %p1130_p7 = pnand %p1129_p6, %p1123_p3 }
  0x12   :  { %1133 = shalt.err (!%p1130_p7)
}
  0x13   :  { %s1232_s13 = smov 64   ;;  %s1233_s14 = smov 4  }
  0x14   :  { %39 = dma.hbm_to_vmem [thread:$0]  %s1382_s1, 1024, %s34_s25, [#allocation6], %s1232_s13, %s1232_s13, %s1233_s14  }
  0x15   :  { %s1134_s19 = scalar_lea.hbm %s1381_s0, 1024 }
  0x16   :  { %p1135_p8 = scmp.ne.s32.totalorder %s1381_s0, %s1134_s19  ;;  %p1138_p9 = scmp.lt.u32.totalorder %s1134_s19, %s1381_s0 }
  0x18   :  { %p1140_p10 = pnand %p1138_p9, %p1135_p8 }
  0x1a   :  { %1143 = shalt.err (!%p1140_p10)
}
  0x1b   :  { %s1144_s24 = scalar_lea.vmem %s1277_s27, 1024  ;;  %p1149_p12 = scmp.lt.s32.totalorder %s1277_s27, %s1277_s27 }
  0x1c   :  { %p1145_p11 = scmp.ne.s32.totalorder %s1277_s27, %s1144_s24  ;;  %p1150_p13 = scmp.lt.s32.totalorder %s1144_s24, %s1144_s24 }
  0x1e   :  { %p1151_p0 = por %p1150_p13, %p1149_p12 }
  0x20   :  { %p1152_p1 = pnand %p1151_p0, %p1145_p11 }
  0x22   :  { %1155 = shalt.err (!%p1152_p1)
}
  0x23   :  { %27 = dma.hbm_to_vmem [thread:$0]  %s1381_s0, 1024, %s1277_s27, [#allocation3], %s1232_s13, %s1232_s13, %s1233_s14  }
  0x24   :  { %s1234_s26 = smov [#allocation7]   ;;  %s1235_s29 = smov [#allocation8]  }
  0x25   :  { %s47_s28 = sshll.u32 %s1234_s26, 4  ;;  %s61_s30 = sshll.u32 %s1235_s29, 4  ;;  %s48_s28 = int_to_ptr.vmem [resolvable:$true] %s47_s28  ;;  %s1314_s30 = int_to_ptr.vmem [resolvable:$true] %s61_s30 }
  0x26   :  { %s1156_s10 = scalar_lea.hbm %s1384_s3, 1024 }
  0x27   :  { %p1157_p2 = scmp.ne.s32.totalorder %s1384_s3, %s1156_s10  ;;  %p1160_p3 = scmp.lt.u32.totalorder %s1156_s10, %s1384_s3 }
  0x29   :  { %p1162_p4 = pnand %p1160_p3, %p1157_p2 }
  0x2b   :  { %1165 = shalt.err (!%p1162_p4)
}
  0x2c   :  { %s1166_s0 = scalar_lea.vmem %s48_s28, 1024  ;;  %p1171_p6 = scmp.lt.s32.totalorder %s48_s28, %s48_s28 }
  0x2d   :  { %p1167_p5 = scmp.ne.s32.totalorder %s48_s28, %s1166_s0  ;;  %p1172_p7 = scmp.lt.s32.totalorder %s1166_s0, %s1166_s0 }
  0x2f   :  { %p1173_p8 = por %p1172_p7, %p1171_p6 }
  0x31   :  { %p1174_p9 = pnand %p1173_p8, %p1167_p5 }
  0x33   :  { %1177 = shalt.err (!%p1174_p9)
}
  0x34   :  { %53 = dma.hbm_to_vmem [thread:$0]  %s1384_s3, 1024, %s48_s28, [#allocation6], %s1232_s13, %s1232_s13, %s1233_s14  }
  0x35   :  { %s1178_s20 = scalar_lea.hbm %s1386_s5, 1024 }
  0x36   :  { %p1179_p10 = scmp.ne.s32.totalorder %s1386_s5, %s1178_s20  ;;  %p1182_p11 = scmp.lt.u32.totalorder %s1178_s20, %s1386_s5 }
  0x38   :  { %p1184_p12 = pnand %p1182_p11, %p1179_p10 }
  0x3a   :  { %1187 = shalt.err (!%p1184_p12)
}
  0x3b   :  { %s1188_s1 = scalar_lea.vmem %s1314_s30, 1024  ;;  %p1193_p0 = scmp.lt.s32.totalorder %s1314_s30, %s1314_s30 }
  0x3c   :  { %p1189_p13 = scmp.ne.s32.totalorder %s1314_s30, %s1188_s1  ;;  %p1194_p1 = scmp.lt.s32.totalorder %s1188_s1, %s1188_s1 }
  0x3e   :  { %p1195_p2 = por %p1194_p1, %p1193_p0 }
  0x40   :  { %p1196_p3 = pnand %p1195_p2, %p1189_p13 }
  0x42   :  { %1199 = shalt.err (!%p1196_p3)
}
  0x43   :  { %67 = dma.hbm_to_vmem [thread:$0]  %s1386_s5, 1024, %s1314_s30, [#allocation9], %s1232_s13, %s1232_s13, %s1233_s14  }
  0x44   :  { %1222 = dma.done.wait [#allocation3], 1024  }
  0x45   :  { %1223 = vsyncadd [#allocation3], 4294966272 }
  0x46   :  { %1224 = dma.done.wait [#allocation6], 2048  }
  0x47   :  { %1225 = vsyncadd [#allocation6], 4294965248 }
  0x48   :  { %1226 = dma.done.wait [#allocation9], 1024  }
  0x49   :  { %1227 = vsyncadd [#allocation9], 4294966272  ;;  %v1080_v0 = vld [vmem:[#allocation5] sm:$0xff]   ;;  %v1081_v1 = vld [vmem:[#allocation5 + $0x8] sm:$0xff]  }
  0x4a   :  { %961 = vmatprep.subr.bf16.mxu0 %v1080_v0  ;;  %v1082_v2 = vld [vmem:[#allocation5 + $0x10] sm:$0xff]   ;;  %v1083_v3 = vld [vmem:[#allocation5 + $0x18] sm:$0xff]   ;;  %v1088_v4 = vld [vmem:[#allocation2] sm:$0xff]  }
  0x4b   :  { %962 = vmatpush3.bf16.msra.mxu0 %v1080_v0  ;;  %977 = vmatprep.mubr.bf16.mxu0 %v1088_v4  ;;  %v1084_v5 = vld [vmem:[#allocation5 + $0x20] sm:$0xff]   ;;  %v1085_v6 = vld [vmem:[#allocation5 + $0x28] sm:$0xff]   ;;  %v1086_v9 = vld [vmem:[#allocation5 + $0x30] sm:$0xff]  }
  0x4c   :  { %963 = vmatprep.subr.bf16.mxu0 %v1081_v1  ;;  %v1096_v7 = vld [vmem:[#allocation7] sm:$0xff]   ;;  %v1097_v8 = vld [vmem:[#allocation7 + $0x8] sm:$0xff]   ;;  %v1098_v10 = vld [vmem:[#allocation7 + $0x10] sm:$0xff]  }
  0x4d   :  { %993 = vmatprep.subr.bf16.mxu1 %v1096_v7  ;;  %v1087_v11 = vld [vmem:[#allocation5 + $0x38] sm:$0xff]   ;;  %v1100_v13 = vld [vmem:[#allocation7 + $0x20] sm:$0xff]   ;;  %v1089_v14 = vld [vmem:[#allocation2 + $0x8] sm:$0xff]  }
  0x4e   :  { %994 = vmatpush3.bf16.msra.mxu1 %v1096_v7  ;;  %v1099_v12 = vld [vmem:[#allocation7 + $0x18] sm:$0xff]   ;;  %v1090_v15 = vld [vmem:[#allocation2 + $0x10] sm:$0xff]   ;;  %v1092_v17 = vld [vmem:[#allocation2 + $0x20] sm:$0xff]  }
  0x4f   :  { %964 = vmatpush3.bf16.msra.mxu0 %v1081_v1  ;;  %995 = vmatprep.subr.bf16.mxu1 %v1097_v8  ;;  %v1091_v16 = vld [vmem:[#allocation2 + $0x18] sm:$0xff]   ;;  %v1093_v18 = vld [vmem:[#allocation2 + $0x28] sm:$0xff]   ;;  %v1094_v19 = vld [vmem:[#allocation2 + $0x30] sm:$0xff]  }
  0x50   :  { %965 = vmatprep.subr.bf16.mxu0 %v1082_v2  ;;  %v1095_v20 = vld [vmem:[#allocation2 + $0x38] sm:$0xff]   ;;  %v1101_v21 = vld [vmem:[#allocation7 + $0x28] sm:$0xff]   ;;  %v1102_v22 = vld [vmem:[#allocation7 + $0x30] sm:$0xff]  }
  0x51   :  { %v1103_v23 = vld [vmem:[#allocation7 + $0x38] sm:$0xff]   ;;  %v1104_v24 = vld [vmem:[#allocation8] sm:$0xff]   ;;  %v1105_v25 = vld [vmem:[#allocation8 + $0x8] sm:$0xff]  }
  0x52   :  { %996 = vmatpush3.bf16.msra.mxu1 %v1097_v8  ;;  %v1106_v26 = vld [vmem:[#allocation8 + $0x10] sm:$0xff]   ;;  %v1107_v27 = vld [vmem:[#allocation8 + $0x18] sm:$0xff]   ;;  %v1351_v28 = vld [vmem:[#allocation8 + $0x20] sm:$0xff]  }
  0x53   :  { %966 = vmatpush3.bf16.msra.mxu0 %v1082_v2  ;;  %997 = vmatprep.subr.bf16.mxu1 %v1098_v10  ;;  %v799_v30 = vld [vmem:[%s1383_s2] ss:$0 sm:$0xff] }
  0x54   :  { %967 = vmatprep.subr.bf16.mxu0 %v1083_v3 }
  0x56   :  { %998 = vmatpush3.bf16.msra.mxu1 %v1098_v10 }
  0x57   :  { %968 = vmatpush3.bf16.msra.mxu0 %v1083_v3  ;;  %999 = vmatprep.subr.bf16.mxu1 %v1099_v12 }
  0x58   :  { %969 = vmatprep.subr.bf16.mxu0 %v1084_v5 }
  0x5a   :  { %1000 = vmatpush3.bf16.msra.mxu1 %v1099_v12 }
  0x5b   :  { %970 = vmatpush3.bf16.msra.mxu0 %v1084_v5  ;;  %1001 = vmatprep.subr.bf16.mxu1 %v1100_v13 }
  0x5c   :  { %971 = vmatprep.subr.bf16.mxu0 %v1085_v6 }
  0x5e   :  { %1002 = vmatpush3.bf16.msra.mxu1 %v1100_v13 }
  0x5f   :  { %972 = vmatpush3.bf16.msra.mxu0 %v1085_v6  ;;  %1003 = vmatprep.subr.bf16.mxu1 %v1101_v21 }
  0x60   :  { %973 = vmatprep.subr.bf16.mxu0 %v1086_v9 }
  0x62   :  { %1004 = vmatpush3.bf16.msra.mxu1 %v1101_v21 }
  0x63   :  { %974 = vmatpush3.bf16.msra.mxu0 %v1086_v9  ;;  %1005 = vmatprep.subr.bf16.mxu1 %v1102_v22 }
  0x64   :  { %975 = vmatprep.subr.bf16.mxu0 %v1087_v11 }
  0x66   :  { %1006 = vmatpush3.bf16.msra.mxu1 %v1102_v22  ;;  %v1109_v22 = vld [vmem:[#allocation8 + $0x28] sm:$0xff]  }
  0x67   :  { %976 = vmatpush3.bf16.msra.mxu0 %v1087_v11  ;;  %1007 = vmatprep.subr.bf16.mxu1 %v1103_v23 }
  0x68   :  { %1025 = vmatprep.subr.bf16.mxu0 %v1104_v24 }
  0x6a   :  { %978 = vmatmul.mubr.bf16.vlgmr.msra.gmra.mrb[0].mxu0 %v1089_v14  ;;  %1008 = vmatpush3.bf16.msra.mxu1 %v1103_v23  ;;  %v1110_v23 = vld [vmem:[#allocation8 + $0x30] sm:$0xff]  }
  0x6b   :  { %981 = vmatprep.mubr.bf16.mxu0 %v1090_v15  ;;  %1057 = vmatprep.subr.bf16.mxu1 %v1104_v24 }
  0x6c   :  { %1026 = vmatpush3.bf16.msra.mxu0 %v1104_v24 }
  0x6d   :  { %1027 = vmatprep.subr.bf16.mxu0 %v1105_v25 }
  0x70   :  { %1028 = vmatpush3.bf16.msra.mxu0 %v1105_v25 }
  0x71   :  { %1029 = vmatprep.subr.bf16.mxu0 %v1106_v26 }
  0x72   :  { %982 = vmatmul.mubr.bf16.gmra.mrb[4].mxu0 %v1091_v16 }
  0x73   :  { %985 = vmatprep.mubr.bf16.mxu0 %v1092_v17 }
  0x74   :  { %1030 = vmatpush3.bf16.msra.mxu0 %v1106_v26 }
  0x75   :  { %1031 = vmatprep.subr.bf16.mxu0 %v1107_v27 }
  0x78   :  { %1032 = vmatpush3.bf16.msra.mxu0 %v1107_v27 }
  0x79   :  { %1033 = vmatprep.subr.bf16.mxu0 %v1351_v28 }
  0x7a   :  { %986 = vmatmul.mubr.bf16.gmra.mrb[8].mxu0 %v1093_v18 }
  0x7b   :  { %989 = vmatprep.mubr.bf16.mxu0 %v1094_v19 }
  0x7c   :  { %1034 = vmatpush3.bf16.msra.mxu0 %v1351_v28 }
  0x7d   :  { %1035 = vmatprep.subr.bf16.mxu0 %v1109_v22 }
  0x80   :  { %1036 = vmatpush3.bf16.msra.mxu0 %v1109_v22 }
  0x81   :  { %1037 = vmatprep.subr.bf16.mxu0 %v1110_v23 }
  0x82   :  { %990 = vmatmul.mubr.bf16.gmra.mrb[12].mxu0 %v1095_v20 }
  0x84   :  { %1038 = vmatpush3.bf16.msra.mxu0 %v1110_v23 }
 0x13d   :  { %v979_v29 = vpop.f32.mrb[0].mxu0 }
 0x13e   :  { %v253_v31 = vpop.f32.mrb[1].mxu0  ;;  %v262_v33 = vadd.f32 %v979_v29, %v799_v30 }
 0x13f   :  { %v980_v32 = vpop.f32.mrb[2].mxu0  ;;  %v254_v36 = vadd.f32 %v799_v30, %v253_v31 }
 0x140   :  { %v265_v34 = vadd.f32 %v980_v32, %v799_v30  ;;  %v256_v35 = vpop.f32.mrb[3].mxu0 }
 0x141   :  { %v257_v37 = vadd.f32 %v799_v30, %v256_v35 }
 0x142   :  { %v317_v38 = vpack.c.bf16 %v265_v34, %v262_v33 }
 0x143   :  { %v316_v39 = vpack.c.bf16 %v257_v37, %v254_v36 }
 0x144   :  { %v325_v40 = vmul.bf16 1009007652, %v317_v38 }
 0x145   :  { %v983_v41 = vpop.f32.mrb[4].mxu0  ;;  %v324_v42 = vmul.bf16 1009007652, %v316_v39 }
 0x146   :  { %v269_v43 = vpop.f32.mrb[5].mxu0  ;;  %v278_v46 = vadd.f32 %v983_v41, %v799_v30  ;;  %v333_v49 = vmax.bf16 %v325_v40, %v317_v38 }
 0x147   :  { %v984_v44 = vpop.f32.mrb[6].mxu0  ;;  %v332_v45 = vmax.bf16 %v324_v42, %v316_v39  ;;  %v270_v50 = vadd.f32 %v799_v30, %v269_v43 }
 0x148   :  { %v281_v47 = vadd.f32 %v984_v44, %v799_v30  ;;  %v272_v48 = vpop.f32.mrb[7].mxu0 }
 0x149   :  { %v273_v51 = vadd.f32 %v799_v30, %v272_v48  ;;  %1009 = vmatprep.mubr.bf16.mxu1 %v332_v45 }
 0x14a   :  { %v319_v52 = vpack.c.bf16 %v281_v47, %v278_v46  ;;  %1010 = vmatmul.mubr.bf16.vlgmr.msra.gmra.mrb[0].mxu1 %v333_v49 }
 0x14b   :  { %v318_v53 = vpack.c.bf16 %v273_v51, %v270_v50  ;;  %1065 = vmatpush3.bf16.msra.mxu1 %v1104_v24  ;;  %v1111_v24 = vld [vmem:[#allocation8 + $0x38] sm:$0xff]  }
 0x14c   :  { %v327_v54 = vmul.bf16 1009007652, %v319_v52  ;;  %1058 = vmatprep.subr.bf16.mxu1 %v1105_v25  ;;  %1039 = vmatprep.subr.bf16.mxu0 %v1111_v24 }
 0x14d   :  { %v326_v55 = vmul.bf16 1009007652, %v318_v53  ;;  %v987_v56 = vpop.f32.mrb[8].mxu0  ;;  %1040 = vmatpush3.bf16.msra.mxu0 %v1111_v24 }
 0x14e   :  { %v285_v57 = vpop.f32.mrb[9].mxu0  ;;  %v294_v60 = vadd.f32 %v987_v56, %v799_v30  ;;  %v335_v63 = vmax.bf16 %v327_v54, %v319_v52 }
 0x14f   :  { %v988_v58 = vpop.f32.mrb[10].mxu0  ;;  %v334_v59 = vmax.bf16 %v326_v55, %v318_v53  ;;  %1066 = vmatpush3.bf16.msra.mxu1 %v1105_v25  ;;  %v286_v0 = vadd.f32 %v799_v30, %v285_v57 }
 0x150   :  { %v297_v61 = vadd.f32 %v988_v58, %v799_v30  ;;  %v288_v62 = vpop.f32.mrb[11].mxu0  ;;  %1059 = vmatprep.subr.bf16.mxu1 %v1106_v26 }
 0x151   :  { %v289_v1 = vadd.f32 %v799_v30, %v288_v62  ;;  %1013 = vmatprep.mubr.bf16.mxu1 %v334_v59 }
 0x152   :  { %v321_v2 = vpack.c.bf16 %v297_v61, %v294_v60  ;;  %1014 = vmatmul.mubr.bf16.gmra.mrb[4].mxu1 %v335_v63 }
 0x153   :  { %v320_v3 = vpack.c.bf16 %v289_v1, %v286_v0  ;;  %1067 = vmatpush3.bf16.msra.mxu1 %v1106_v26  ;;  %v816_v26 = vld [vmem:[%s1385_s4] ss:$0 sm:$0xff] }
 0x154   :  { %v329_v4 = vmul.bf16 1009007652, %v321_v2  ;;  %1060 = vmatprep.subr.bf16.mxu1 %v1107_v27 }
 0x155   :  { %v328_v5 = vmul.bf16 1009007652, %v320_v3  ;;  %v991_v6 = vpop.f32.mrb[12].mxu0 }
 0x156   :  { %v301_v7 = vpop.f32.mrb[13].mxu0  ;;  %v310_v10 = vadd.f32 %v991_v6, %v799_v30  ;;  %v337_v13 = vmax.bf16 %v329_v4, %v321_v2 }
 0x157   :  { %v992_v8 = vpop.f32.mrb[14].mxu0  ;;  %v336_v9 = vmax.bf16 %v328_v5, %v320_v3  ;;  %1068 = vmatpush3.bf16.msra.mxu1 %v1107_v27  ;;  %v302_v14 = vadd.f32 %v799_v30, %v301_v7 }
 0x158   :  { %v313_v11 = vadd.f32 %v992_v8, %v799_v30  ;;  %v304_v12 = vpop.f32.mrb[15].mxu0  ;;  %1061 = vmatprep.subr.bf16.mxu1 %v1351_v28 }
 0x159   :  { %v305_v15 = vadd.f32 %v799_v30, %v304_v12  ;;  %1017 = vmatprep.mubr.bf16.mxu1 %v336_v9 }
 0x15a   :  { %v323_v16 = vpack.c.bf16 %v313_v11, %v310_v10  ;;  %1018 = vmatmul.mubr.bf16.gmra.mrb[8].mxu1 %v337_v13 }
 0x15b   :  { %v322_v17 = vpack.c.bf16 %v305_v15, %v302_v14  ;;  %1069 = vmatpush3.bf16.msra.mxu1 %v1351_v28 }
 0x15c   :  { %v331_v18 = vmul.bf16 1009007652, %v323_v16  ;;  %1062 = vmatprep.subr.bf16.mxu1 %v1109_v22 }
 0x15d   :  { %v330_v19 = vmul.bf16 1009007652, %v322_v17 }
 0x15e   :  { %v339_v21 = vmax.bf16 %v331_v18, %v323_v16 }
 0x15f   :  { %v338_v20 = vmax.bf16 %v330_v19, %v322_v17  ;;  %1070 = vmatpush3.bf16.msra.mxu1 %v1109_v22  ;;  %v825_v19 = vld [vmem:[%s1387_s6] ss:$0 sm:$0xff]  ;;  %s1236_s6 = smov [#allocation10]  }
 0x160   :  { %1063 = vmatprep.subr.bf16.mxu1 %v1110_v23  ;;  %s785_s30 = sshll.u32 %s1236_s6, 4  ;;  %s786_s30 = int_to_ptr.vmem [resolvable:$true] %s785_s30 }
 0x161   :  { %1021 = vmatprep.mubr.bf16.mxu1 %v338_v20  ;;  %s1200_s8 = scalar_lea.vmem %s786_s30, 1024  ;;  %p1205_p5 = scmp.lt.s32.totalorder %s786_s30, %s786_s30 }
 0x162   :  { %1022 = vmatmul.mubr.bf16.gmra.mrb[12].mxu1 %v339_v21  ;;  %p1201_p4 = scmp.ne.s32.totalorder %s786_s30, %s1200_s8  ;;  %p1206_p6 = scmp.lt.s32.totalorder %s1200_s8, %s1200_s8 }
 0x163   :  { %1071 = vmatpush3.bf16.msra.mxu1 %v1110_v23 }
 0x164   :  { %1064 = vmatprep.subr.bf16.mxu1 %v1111_v24  ;;  %p1207_p7 = por %p1206_p6, %p1205_p5 }
 0x166   :  { %p1208_p8 = pnand %p1207_p7, %p1201_p4 }
 0x167   :  { %1072 = vmatpush3.bf16.msra.mxu1 %v1111_v24 }
 0x21d   :  { %v1011_v25 = vpop.f32.mrb[0].mxu1 }
 0x21e   :  { %v445_v27 = vpop.f32.mrb[1].mxu1  ;;  %v454_v29 = vadd.f32 %v1011_v25, %v816_v26 }
 0x21f   :  { %v1012_v28 = vpop.f32.mrb[2].mxu1  ;;  %v446_v32 = vadd.f32 %v816_v26, %v445_v27 }
 0x220   :  { %v457_v30 = vadd.f32 %v1012_v28, %v816_v26  ;;  %v448_v31 = vpop.f32.mrb[3].mxu1 }
 0x221   :  { %v449_v33 = vadd.f32 %v816_v26, %v448_v31 }
 0x222   :  { %v509_v34 = vpack.c.bf16 %v457_v30, %v454_v29 }
 0x223   :  { %v508_v35 = vpack.c.bf16 %v449_v33, %v446_v32 }
 0x224   :  { %v517_v36 = vmul.bf16 1009007652, %v509_v34 }
 0x225   :  { %v516_v37 = vmul.bf16 1009007652, %v508_v35  ;;  %v1015_v38 = vpop.f32.mrb[4].mxu1 }
 0x226   :  { %v461_v39 = vpop.f32.mrb[5].mxu1  ;;  %v525_v42 = vmax.bf16 %v517_v36, %v509_v34  ;;  %v470_v43 = vadd.f32 %v1015_v38, %v816_v26 }
 0x227   :  { %v1016_v40 = vpop.f32.mrb[6].mxu1  ;;  %v524_v41 = vmax.bf16 %v516_v37, %v508_v35  ;;  %v462_v46 = vadd.f32 %v816_v26, %v461_v39 }
 0x228   :  { %v473_v44 = vadd.f32 %v1016_v40, %v816_v26  ;;  %v464_v45 = vpop.f32.mrb[7].mxu1 }
 0x229   :  { %v465_v47 = vadd.f32 %v816_v26, %v464_v45  ;;  %1041 = vmatprep.mubr.bf16.mxu0 %v524_v41 }
 0x22a   :  { %v511_v48 = vpack.c.bf16 %v473_v44, %v470_v43  ;;  %1042 = vmatmul.mubr.bf16.vlgmr.msra.gmra.mrb[16].mxu0 %v525_v42 }
 0x22b   :  { %v510_v49 = vpack.c.bf16 %v465_v47, %v462_v46 }
 0x22c   :  { %v519_v50 = vmul.bf16 1009007652, %v511_v48 }
 0x22d   :  { %v518_v51 = vmul.bf16 1009007652, %v510_v49  ;;  %v1019_v52 = vpop.f32.mrb[8].mxu1 }
 0x22e   :  { %v477_v53 = vpop.f32.mrb[9].mxu1  ;;  %v486_v56 = vadd.f32 %v1019_v52, %v816_v26  ;;  %v527_v59 = vmax.bf16 %v519_v50, %v511_v48 }
 0x22f   :  { %v1020_v54 = vpop.f32.mrb[10].mxu1  ;;  %v526_v55 = vmax.bf16 %v518_v51, %v510_v49  ;;  %v478_v60 = vadd.f32 %v816_v26, %v477_v53 }
 0x230   :  { %v489_v57 = vadd.f32 %v1020_v54, %v816_v26  ;;  %v480_v58 = vpop.f32.mrb[11].mxu1 }
 0x231   :  { %v481_v61 = vadd.f32 %v816_v26, %v480_v58  ;;  %1045 = vmatprep.mubr.bf16.mxu0 %v526_v55 }
 0x232   :  { %v513_v62 = vpack.c.bf16 %v489_v57, %v486_v56  ;;  %1046 = vmatmul.mubr.bf16.gmra.mrb[20].mxu0 %v527_v59 }
 0x233   :  { %v512_v63 = vpack.c.bf16 %v481_v61, %v478_v60 }
 0x234   :  { %v521_v0 = vmul.bf16 1009007652, %v513_v62 }
 0x235   :  { %v520_v1 = vmul.bf16 1009007652, %v512_v63  ;;  %v1023_v2 = vpop.f32.mrb[12].mxu1 }
 0x236   :  { %v493_v3 = vpop.f32.mrb[13].mxu1  ;;  %v529_v6 = vmax.bf16 %v521_v0, %v513_v62  ;;  %v502_v7 = vadd.f32 %v1023_v2, %v816_v26 }
 0x237   :  { %v1024_v4 = vpop.f32.mrb[14].mxu1  ;;  %v528_v5 = vmax.bf16 %v520_v1, %v512_v63  ;;  %v494_v10 = vadd.f32 %v816_v26, %v493_v3 }
 0x238   :  { %v505_v8 = vadd.f32 %v1024_v4, %v816_v26  ;;  %v496_v9 = vpop.f32.mrb[15].mxu1 }
 0x239   :  { %v497_v11 = vadd.f32 %v816_v26, %v496_v9  ;;  %1049 = vmatprep.mubr.bf16.mxu1 %v528_v5 }
 0x23a   :  { %v515_v12 = vpack.c.bf16 %v505_v8, %v502_v7  ;;  %1050 = vmatmul.mubr.bf16.vlgmr.msra.gmra.mrb[16].mxu1 %v529_v6 }
 0x23b   :  { %v514_v13 = vpack.c.bf16 %v497_v11, %v494_v10 }
 0x23c   :  { %v523_v14 = vmul.bf16 1009007652, %v515_v12 }
 0x23d   :  { %v522_v15 = vmul.bf16 1009007652, %v514_v13 }
 0x23e   :  { %v531_v17 = vmax.bf16 %v523_v14, %v515_v12 }
 0x23f   :  { %v530_v16 = vmax.bf16 %v522_v15, %v514_v13 }
 0x241   :  { %1053 = vmatprep.mubr.bf16.mxu1 %v530_v16 }
 0x242   :  { %1054 = vmatmul.mubr.bf16.gmra.mrb[20].mxu1 %v531_v17 }
 0x2fd   :  { %v1043_v18 = vpop.f32.mrb[16].mxu0 }
 0x2fe   :  { %v637_v20 = vpop.f32.mrb[17].mxu0  ;;  %v646_v22 = vadd.f32 %v1043_v18, %v825_v19 }
 0x2ff   :  { %v1044_v21 = vpop.f32.mrb[18].mxu0  ;;  %v638_v25 = vadd.f32 %v825_v19, %v637_v20 }
 0x300   :  { %v649_v23 = vadd.f32 %v1044_v21, %v825_v19  ;;  %v640_v24 = vpop.f32.mrb[19].mxu0 }
 0x301   :  { %v641_v26 = vadd.f32 %v825_v19, %v640_v24 }
 0x302   :  { %v874_v27 = vpack.c.bf16 %v649_v23, %v646_v22 }
 0x303   :  { %v869_v28 = vpack.c.bf16 %v641_v26, %v638_v25 }
 0x304   :  { %906 = vst [vmem:[#allocation10 + $0x8] sm:$0xff] %v874_v27  }
 0x305   :  { %870 = vst [vmem:[#allocation10] sm:$0xff] %v869_v28   ;;  %v1047_v29 = vpop.f32.mrb[20].mxu0 }
 0x306   :  { %v653_v30 = vpop.f32.mrb[21].mxu0  ;;  %v662_v32 = vadd.f32 %v1047_v29, %v825_v19 }
 0x307   :  { %v1048_v31 = vpop.f32.mrb[22].mxu0  ;;  %v654_v35 = vadd.f32 %v825_v19, %v653_v30 }
 0x308   :  { %v665_v33 = vadd.f32 %v1048_v31, %v825_v19  ;;  %v656_v34 = vpop.f32.mrb[23].mxu0 }
 0x309   :  { %v657_v36 = vadd.f32 %v825_v19, %v656_v34 }
 0x30a   :  { %v884_v37 = vpack.c.bf16 %v665_v33, %v662_v32 }
 0x30b   :  { %v879_v38 = vpack.c.bf16 %v657_v36, %v654_v35 }
 0x30c   :  { %908 = vst [vmem:[#allocation10 + $0x18] sm:$0xff] %v884_v37  }
 0x30d   :  { %907 = vst [vmem:[#allocation10 + $0x10] sm:$0xff] %v879_v38   ;;  %v1051_v39 = vpop.f32.mrb[16].mxu1 }
 0x30e   :  { %v669_v40 = vpop.f32.mrb[17].mxu1  ;;  %v678_v42 = vadd.f32 %v1051_v39, %v825_v19 }
 0x30f   :  { %v1052_v41 = vpop.f32.mrb[18].mxu1  ;;  %v670_v45 = vadd.f32 %v825_v19, %v669_v40 }
 0x310   :  { %v681_v43 = vadd.f32 %v1052_v41, %v825_v19  ;;  %v672_v44 = vpop.f32.mrb[19].mxu1 }
 0x311   :  { %v673_v46 = vadd.f32 %v825_v19, %v672_v44 }
 0x312   :  { %v894_v47 = vpack.c.bf16 %v681_v43, %v678_v42 }
 0x313   :  { %v889_v48 = vpack.c.bf16 %v673_v46, %v670_v45 }
 0x314   :  { %910 = vst [vmem:[#allocation10 + $0x28] sm:$0xff] %v894_v47  }
 0x315   :  { %909 = vst [vmem:[#allocation10 + $0x20] sm:$0xff] %v889_v48   ;;  %v1055_v49 = vpop.f32.mrb[20].mxu1 }
 0x316   :  { %v685_v50 = vpop.f32.mrb[21].mxu1  ;;  %v694_v52 = vadd.f32 %v1055_v49, %v825_v19 }
 0x317   :  { %v1056_v51 = vpop.f32.mrb[22].mxu1  ;;  %v686_v55 = vadd.f32 %v825_v19, %v685_v50 }
 0x318   :  { %v697_v53 = vadd.f32 %v1056_v51, %v825_v19  ;;  %v688_v54 = vpop.f32.mrb[23].mxu1 }
 0x319   :  { %v689_v56 = vadd.f32 %v825_v19, %v688_v54 }
 0x31a   :  { %v904_v57 = vpack.c.bf16 %v697_v53, %v694_v52 }
 0x31b   :  { %v899_v58 = vpack.c.bf16 %v689_v56, %v686_v55 }
 0x31c   :  { %912 = vst [vmem:[#allocation10 + $0x38] sm:$0xff] %v904_v57  }
 0x31d   :  { %911 = vst [vmem:[#allocation10 + $0x30] sm:$0xff] %v899_v58  }
 0x31e   :  { %1211 = shalt.err (!%p1208_p8)
}
 0x31f   :  { %s1212_s11 = scalar_lea.hbm %s1388_s7, 1024 }
 0x320   :  { %p1213_p9 = scmp.ne.s32.totalorder %s1388_s7, %s1212_s11  ;;  %p1216_p10 = scmp.lt.u32.totalorder %s1212_s11, %s1388_s7 }
 0x322   :  { %p1218_p11 = pnand %p1216_p10, %p1213_p9 }
 0x324   :  { %1221 = shalt.err (!%p1218_p11)
}
 0x325   :  { %791 = dma.vmem_to_hbm [thread:$0]  %s786_s30, 1024, %s1388_s7, [#allocation4], %s1232_s13, %s1232_s13, %s1233_s14  }
 0x326   :  { %1228 = dma.done.wait [#allocation4], 1024  }
 0x327   :  { %1229 = vsyncadd [#allocation4], 4294966272 }
 0x328   :  { %795 = vsyncpa [#allocation3], 1 }
 0x329   :  { %796 = vsyncpa [#allocation6], 1 }
 0x32a   :  { %797 = vsyncpa [#allocation9], 1 }
 0x32b   :  { %798 = vsyncpa [#allocation4], 1 }

</bundles_post_ra>
